<compile_context>
chip_gen: v7x
topology: tpu7x:2x2x1
jax: 0.10.0
libtpu: 0.0.40
codegen_flags: <defaults>
</compile_context>

<pallas_src>
import jax
import jax.numpy as jnp
from jax import lax
from jax.experimental import pallas as pl
from jax.experimental.pallas import tpu as pltpu


_NEG_LARGE = -1e30   # finite stand-in for -inf (masks padded classes)


def _round_up(x, m):
    return ((x + m - 1) // m) * m


def _cdiv(a, b):
    return -(-a // b)


def _tpu_budgets():
    """Generation-aware VMEM budgets.

    Returns (block_budget_bytes, vmem_limit_bytes, assume_two_tensorcores).
    """
    cap = None
    try:
        cap = int(pltpu.get_tpu_info().vmem_capacity_bytes)
    except Exception:
        cap = None
    if cap is None or cap < 96 * 1024 * 1024:
        # v7x-class part (64 MiB VMEM per TC, 2 TCs) or unknown -> conservative.
        return 40 * 1024 * 1024, 48 * 1024 * 1024, True
    # v5e / v6e: 128 MiB VMEM, single TensorCore per chip.
    return 96 * 1024 * 1024, 112 * 1024 * 1024, False


def _log_softmax_rows(logits):
    m = jnp.max(logits, axis=-1, keepdims=True)
    s = logits - m
    lse = jnp.log(jnp.sum(jnp.exp(s), axis=-1, keepdims=True))
    return s - lse


def _single_step_kernel(x_ref, w_ref, b_ref, o_ref):
    """Whole feature axis in one block: dot + bias + log_softmax, no scratch.

    x_ref/w_ref are bf16; accumulation is f32 via preferred_element_type.
    W's block index is constant across the whole grid, so it is DMA'd once.
    """
    logits = lax.dot_general(
        x_ref[...], w_ref[...],
        dimension_numbers=(((1,), (1,)), ((), ())),   # (B,F)·(Cp,F) contract on F
        preferred_element_type=jnp.float32,
    ) + b_ref[...]
    o_ref[...] = _log_softmax_rows(logits)


def _ktiled_kernel(x_ref, w_ref, b_ref, o_ref):
    """K-tiled path: accumulate into the resident f32 output block (no scratch)."""
    k = pl.program_id(1)

    @pl.when(k == 0)
    def _():
        # Fold the bias into the accumulator init.
        o_ref[...] = jnp.broadcast_to(b_ref[...], o_ref.shape)

    o_ref[...] += lax.dot_general(
        x_ref[...], w_ref[...],
        dimension_numbers=(((1,), (1,)), ((), ())),
        preferred_element_type=jnp.float32,
    )

    @pl.when(k == pl.num_programs(1) - 1)
    def _():
        o_ref[...] = _log_softmax_rows(o_ref[...])


def prepare_classifier_params(weight, bias):
    """One-time parameter prep (call OUTSIDE the hot loop).

    weight : (no_c_outputs, total_units)  -- PyTorch nn.Linear convention (C, F)
    bias   : (no_c_outputs,)

    Classes are padded to a multiple of 128 (lane-dense output); padded classes
    get a large negative bias so log_softmax over the padded axis equals
    log_softmax over the real classes.  Features are padded to a multiple of
    128 with zero columns (contribute 0 to the matmul).  The weight is stored
    in bfloat16 (native MXU input dtype); the bias stays f32.
    """
    C, F = weight.shape
    C_pad = _round_up(max(C, 1), 128)
    F_pad = _round_up(F, 128)

    w_pad = jnp.zeros((C_pad, F_pad), jnp.bfloat16).at[:C, :F].set(
        weight.astype(jnp.bfloat16))
    b_pad = jnp.full((1, C_pad), _NEG_LARGE, jnp.float32).at[0, :C].set(
        bias.astype(jnp.float32))
    return w_pad, b_pad, C, F


def classifier_forward(x_nchw, w_pad, b_pad, num_classes, num_features):
    """Hot path: flatten -> (dropout p=0) -> linear -> log_softmax."""
    B = x_nchw.shape[0]
    x = x_nchw.reshape(B, -1)                    # == torch .view(B, -1)
    assert x.shape[1] == num_features
    if x.dtype != jnp.bfloat16:
        # bf16 MXU inputs; supply bf16 features upstream to skip this pass.
        x = x.astype(jnp.bfloat16)

    C_pad, F_pad = w_pad.shape

    # Zero-pad features only when misaligned (zero columns add 0 to the dot).
    if F_pad != num_features:
        x = jnp.pad(x, ((0, 0), (0, F_pad - num_features)))

    block_budget, vmem_limit, two_cores = _tpu_budgets()

    # ---- batch tiling: multiple of 8, minimal padding; on 2-TC parts ensure
    # at least two blocks so the "parallel" axis shards across both cores. ----
    if B <= 8:
        tb = 8
    else:
        min_blocks = 2 if two_cores else 1
        n_b_target = max(min_blocks, _cdiv(B, 256))   # cap block rows at ~256
        tb = _round_up(_cdiv(B, n_b_target), 8)
    B_pad = _round_up(B, tb)
    if B_pad != B:
        x = jnp.pad(x, ((0, B_pad - B), (0, 0)))
    n_b = B_pad // tb

    # ---- feature (K) tiling ----
    def fits(tk_, k_tiled):
        x_bytes = 2 * tb * tk_ * 2                          # bf16, double-buffered
        w_bytes = (2 if k_tiled else 1) * C_pad * tk_ * 2   # bf16; 1 buf if constant
        o_bytes = tb * C_pad * 4                            # f32, resident across K
        bias_bytes = C_pad * 4
        return x_bytes + w_bytes + o_bytes + bias_bytes <= block_budget

    if fits(F_pad, False):
        tk = F_pad               # single K step: W fetched once for all batch tiles
    else:
        tk = 128                 # always divides F_pad and (almost) always fits
        for cand in range(F_pad - 128, 128, -128):
            if F_pad % cand == 0 and fits(cand, True):
                tk = cand        # largest fitting multiple-of-128 divisor
                break

    n_k = F_pad // tk
    kernel = _single_step_kernel if n_k == 1 else _ktiled_kernel

    out = pl.pallas_call(
        kernel,
        out_shape=jax.ShapeDtypeStruct((B_pad, C_pad), jnp.float32),
        grid_spec=pltpu.PrefetchScalarGridSpec(
            num_scalar_prefetch=0,
            grid=(n_b, n_k),
            in_specs=[
                pl.BlockSpec((tb, tk), lambda i, k: (i, k)),     # x tile (bf16)
                pl.BlockSpec((C_pad, tk), lambda i, k: (0, k)),  # W tile (no transpose)
                pl.BlockSpec((1, C_pad), lambda i, k: (0, 0)),   # bias (resident)
            ],
            out_specs=pl.BlockSpec((tb, C_pad), lambda i, k: (i, 0)),
        ),
        compiler_params=pltpu.CompilerParams(
            dimension_semantics=("parallel", "arbitrary"),
            vmem_limit_bytes=vmem_limit,
        ),
    )(x, w_pad, b_pad)

    return out[:B, :num_classes]


def _reference_forward(x_nchw, weight, bias):
    """Pure-JAX f32 reference mirroring the PyTorch module."""
    B = x_nchw.shape[0]
    x = x_nchw.reshape(B, -1)
    logits = x @ weight.T + bias
    return jax.nn.log_softmax(logits, axis=1)


if __name__ == "__main__":
    key = jax.random.PRNGKey(0)
    k_x, k_w, k_b = jax.random.split(key, 3)

    # Small shapes consistent with the module: NCHW conv features.
    B, C_in, H, W = 2, 4, 16, 16
    total_units = C_in * H * W                 # 1024
    no_c_outputs = 2

    x = jax.random.normal(k_x, (B, C_in, H, W), dtype=jnp.float32)

    # Deterministic nn.Linear-style init: U(-1/sqrt(fan_in), 1/sqrt(fan_in))
    bound = 1.0 / jnp.sqrt(jnp.float32(total_units))
    weight = jax.random.uniform(
        k_w, (no_c_outputs, total_units), minval=-bound, maxval=bound,
        dtype=jnp.float32)
    bias = jax.random.uniform(
        k_b, (no_c_outputs,), minval=-bound, maxval=bound, dtype=jnp.float32)

    # One-time parameter prep (outside the hot loop).
    w_pad, b_pad, C, F = prepare_classifier_params(weight, bias)

    out = classifier_forward(x, w_pad, b_pad, C, F)
    out = jax.block_until_ready(out)

    ref = _reference_forward(x, weight, bias)
    assert out.shape == (B, no_c_outputs)
    # bf16 matmul inputs (f32 accumulate) -> compare to the f32 reference with a
    # correspondingly looser tolerance.
    assert jnp.allclose(out, ref, atol=2e-2, rtol=2e-2), (
        f"mismatch: max abs err {jnp.max(jnp.abs(out - ref))}")

    print("KERNEL_OK")
</pallas_src>

<mosaic_0001>
module attributes {stable_mosaic.version = 11 : i64} {
  func.func @_single_step_kernel(%arg0: i32, %arg1: i32, %arg2: memref<8x1024xbf16, #tpu.memory_space<vmem>>, %arg3: memref<128x1024xbf16, #tpu.memory_space<vmem>>, %arg4: memref<1x128xf32, #tpu.memory_space<vmem>>, %arg5: memref<8x128xf32, #tpu.memory_space<vmem>>) attributes {dimension_semantics = [#tpu.dimension_semantics<parallel>, #tpu.dimension_semantics<arbitrary>], iteration_bounds = array<i64: 1, 1>, scalar_prefetch = 0 : i64, scratch_operands = 0 : i64, tpu.core_type = #tpu.core_type<tc>, window_params = [{transform_indices = @transform_0, window_bounds = array<i64: 8, 1024>}, {transform_indices = @transform_1, window_bounds = array<i64: 128, 1024>}, {pipeline_mode = #tpu.pipeline_mode<synchronous>, transform_indices = @transform_2, window_bounds = array<i64: 1, 128>}, {transform_indices = @transform_3, window_bounds = array<i64: 8, 128>}]} {
    %c0 = arith.constant 0 : index
    %c0_0 = arith.constant 0 : index
    %0 = vector.load %arg2[%c0, %c0_0] : memref<8x1024xbf16, #tpu.memory_space<vmem>>, vector<8x1024xbf16>
    %c0_1 = arith.constant 0 : index
    %c0_2 = arith.constant 0 : index
    %1 = vector.load %arg3[%c0_1, %c0_2] : memref<128x1024xbf16, #tpu.memory_space<vmem>>, vector<128x1024xbf16>
    %cst = arith.constant dense<0.000000e+00> : vector<8x128xf32>
    %2 = tpu.matmul %0, %1, %cst {dimension_numbers = #tpu.dot_dimension_numbers<[1], [1], [0], [0], [0, 0, 1, 0], [], []>} : vector<8x1024xbf16>, vector<128x1024xbf16>, vector<8x128xf32> -> vector<8x128xf32>
    %c0_3 = arith.constant 0 : index
    %c0_4 = arith.constant 0 : index
    %3 = vector.load %arg4[%c0_3, %c0_4] : memref<1x128xf32, #tpu.memory_space<vmem>>, vector<1x128xf32>
    %4 = vector.broadcast %3 : vector<1x128xf32> to vector<8x128xf32>
    %5 = arith.addf %2, %4 : vector<8x128xf32>
    %cst_5 = arith.constant dense<0xFF800000> : vector<8xf32>
    %6 = vector.multi_reduction <maximumf>, %5, %cst_5 [1] : vector<8x128xf32> to vector<8xf32>
    %7 = vector.shape_cast %6 : vector<8xf32> to vector<8x1xf32>
    %8 = vector.broadcast %7 : vector<8x1xf32> to vector<8x128xf32>
    %9 = arith.subf %5, %8 : vector<8x128xf32>
    %10 = math.exp %9 : vector<8x128xf32>
    %cst_6 = arith.constant dense<0.000000e+00> : vector<8xf32>
    %11 = vector.multi_reduction <add>, %10, %cst_6 [1] : vector<8x128xf32> to vector<8xf32>
    %12 = vector.shape_cast %11 : vector<8xf32> to vector<8x1xf32>
    %13 = math.log %12 : vector<8x1xf32>
    %14 = vector.broadcast %13 : vector<8x1xf32> to vector<8x128xf32>
    %15 = arith.subf %9, %14 : vector<8x128xf32>
    %c0_7 = arith.constant 0 : index
    %c0_8 = arith.constant 0 : index
    %16 = vector.load %arg5[%c0_7, %c0_8] : memref<8x128xf32, #tpu.memory_space<vmem>>, vector<8x128xf32>
    tpu.vector_store %arg5[%c0_7, %c0_8], %15 {strides = array<i32>} : memref<8x128xf32, #tpu.memory_space<vmem>>, vector<8x128xf32>,
    return
  }
  func.func @transform_0(%arg0: i32, %arg1: i32) -> (i32, i32) {
    %c0_i32 = arith.constant 0 : i32
    return %arg0, %arg1 : i32, i32
  }
  func.func @transform_1(%arg0: i32, %arg1: i32) -> (i32, i32) {
    %c0_i32 = arith.constant 0 : i32
    %c0_i32_0 = arith.constant 0 : i32
    return %c0_i32, %arg1 : i32, i32
  }
  func.func @transform_2(%arg0: i32, %arg1: i32) -> (i32, i32) {
    %c0_i32 = arith.constant 0 : i32
    %c0_i32_0 = arith.constant 0 : i32
    %c0_i32_1 = arith.constant 0 : i32
    return %c0_i32, %c0_i32_0 : i32, i32
  }
  func.func @transform_3(%arg0: i32, %arg1: i32) -> (i32, i32) {
    %c0_i32 = arith.constant 0 : i32
    %c0_i32_0 = arith.constant 0 : i32
    return %arg0, %c0_i32 : i32, i32
  }
}

</mosaic_0001>

<bundles_post_ra>
// kernel: tpu_custom_call.1
= control target key start
LH: loop header
LB: loop body
LE: loop exit
PB: predicated region body
PF: predicated region fallthrough
CT: control target
= control target key end

     0   :  { %8 = vsyncpa [#allocation3], 0  ;;  %s919_s0 = inlined_call_operand.hbm [shape: bf16[8,1024], index: 0, kind: input, shape index: {}]   ;;  %s920_s1 = inlined_call_operand.hbm [shape: bf16[128,1024], index: 1, kind: input, shape index: {}]   ;;  %s921_s2 = inlined_call_operand.vmem [shape: f32[1,128], index: 2, kind: input, shape index: {}]   ;;  %s922_s3 = inlined_call_operand.hbm [shape: f32[8,128], index: 3, kind: output, shape index: {}]  }
   0x1   :  { %9 = vsyncpa [#allocation6], 0 }
   0x2   :  { %10 = vsyncpa [#allocation4], 0  ;;  %s824_s12 = smov [#allocation2]   ;;  %s825_s14 = smov [#allocation5]  }
   0x3   :  { %s17_s13 = sshll.u32 %s824_s12, 4  ;;  %s26_s15 = sshll.u32 %s825_s14, 4  ;;  %s18_s13 = int_to_ptr.vmem [resolvable:$true] %s17_s13  ;;  %s849_s15 = int_to_ptr.vmem [resolvable:$true] %s26_s15 }
   0x4   :  { %s752_s18 = scalar_lea.hbm %s919_s0, 512 }
   0x5   :  { %p753_p0 = scmp.ne.s32.totalorder %s919_s0, %s752_s18  ;;  %p756_p1 = scmp.lt.u32.totalorder %s752_s18, %s919_s0 }
   0x7   :  { %p758_p2 = pnand %p756_p1, %p753_p0 }
   0x9   :  { %761 = shalt.err (!%p758_p2)
}
   0xa   :  { %s762_s23 = scalar_lea.vmem %s18_s13, 512  ;;  %p767_p4 = scmp.lt.s32.totalorder %s18_s13, %s18_s13 }
   0xb   :  { %p763_p3 = scmp.ne.s32.totalorder %s18_s13, %s762_s23  ;;  %p768_p5 = scmp.lt.s32.totalorder %s762_s23, %s762_s23 }
   0xd   :  { %p769_p6 = por %p768_p5, %p767_p4 }
   0xf   :  { %p770_p7 = pnand %p769_p6, %p763_p3 }
  0x11   :  { %773 = shalt.err (!%p770_p7)
}
  0x12   :  { %20 = dma.hbm_to_vmem [thread:$0]  %s919_s0, 512, %s18_s13, [#allocation3]  }
  0x13   :  { %s774_s28 = scalar_lea.hbm %s920_s1, 8192 }
  0x14   :  { %p775_p8 = scmp.ne.s32.totalorder %s920_s1, %s774_s28  ;;  %p778_p9 = scmp.lt.u32.totalorder %s774_s28, %s920_s1 }
  0x16   :  { %p780_p10 = pnand %p778_p9, %p775_p8 }
  0x18   :  { %783 = shalt.err (!%p780_p10)
}
  0x19   :  { %s784_s6 = scalar_lea.vmem %s849_s15, 8192  ;;  %p789_p12 = scmp.lt.s32.totalorder %s849_s15, %s849_s15 }
  0x1a   :  { %p785_p11 = scmp.ne.s32.totalorder %s849_s15, %s784_s6  ;;  %p790_p13 = scmp.lt.s32.totalorder %s784_s6, %s784_s6 }
  0x1c   :  { %p791_p0 = por %p790_p13, %p789_p12 }
  0x1e   :  { %p792_p1 = pnand %p791_p0, %p785_p11 }
  0x20   :  { %795 = shalt.err (!%p792_p1)
}
  0x21   :  { %s826_s0 = smov 512   ;;  %s827_s7 = smov 32  }
  0x22   :  { %32 = dma.hbm_to_vmem [thread:$0]  %s920_s1, 8192, %s849_s15, [#allocation6], %s826_s0, %s826_s0, %s827_s7  }
  0x23   :  { %818 = dma.done.wait [#allocation3], 512  }
  0x24   :  { %819 = vsyncadd [#allocation3], 4294966784 }
  0x25   :  { %820 = dma.done.wait [#allocation6], 8192  }
  0x26   :  { %821 = vsyncadd [#allocation6], 4294959104  ;;  %v46_v0 = vld [vmem:[#allocation5] sm:$0xff]  ;;  %v48_v2 = vld [vmem:[#allocation5 + $0x10] sm:$0xff] }
  0x27   :  { %v50_v1 = vld [vmem:[#allocation5 + $0x20] sm:$0xff]  ;;  %v52_v4 = vld [vmem:[#allocation5 + $0x30] sm:$0xff] }
  0x28   :  { %v662_v3 = vcombine.high %v46_v0, %v50_v1  ;;  %v661_v5 = vcombine.low %v46_v0, %v50_v1  ;;  %v54_v6 = vld [vmem:[#allocation5 + $0x40] sm:$0xff]  ;;  %v666_v8 = vcombine.high %v48_v2, %v52_v4  ;;  %v665_v9 = vcombine.low %v48_v2, %v52_v4  ;;  %v56_v11 = vld [vmem:[#allocation5 + $0x50] sm:$0xff]  ;;  %v47_v2 = vld [vmem:[#allocation5 + $0x8] sm:$0xff] }
  0x29   :  { %v58_v7 = vld [vmem:[#allocation5 + $0x60] sm:$0xff]  ;;  %v60_v12 = vld [vmem:[#allocation5 + $0x70] sm:$0xff]  ;;  %v49_v4 = vld [vmem:[#allocation5 + $0x18] sm:$0xff] }
  0x2a   :  { %v670_v10 = vcombine.high %v54_v6, %v58_v7  ;;  %465 = vmatprep.subr.bf16.mxu1 %v662_v3  ;;  %v674_v13 = vcombine.high %v56_v11, %v60_v12  ;;  %545 = vmatprep.subr.bf16.mxu0 %v666_v8  ;;  %v62_v14 = vld [vmem:[#allocation5 + $0x80] sm:$0xff]  ;;  %v64_v16 = vld [vmem:[#allocation5 + $0x90] sm:$0xff]  ;;  %v669_v18 = vcombine.low %v54_v6, %v58_v7  ;;  %v51_v3 = vld [vmem:[#allocation5 + $0x28] sm:$0xff] }
  0x2b   :  { %466 = vmatpush1.bf16.xpose.msra.mxu1 %v661_v5  ;;  %546 = vmatpush1.bf16.xpose.msra.mxu0 %v665_v9  ;;  %v66_v15 = vld [vmem:[#allocation5 + $0xa0] sm:$0xff]  ;;  %v68_v17 = vld [vmem:[#allocation5 + $0xb0] sm:$0xff]  ;;  %v673_v19 = vcombine.low %v56_v11, %v60_v12  ;;  %v53_v5 = vld [vmem:[#allocation5 + $0x38] sm:$0xff]  ;;  %v664_v8 = vcombine.high %v47_v2, %v51_v3 }
  0x2c   :  { %467 = vmatprep.subr.bf16.mxu1 %v670_v10  ;;  %547 = vmatprep.subr.bf16.mxu0 %v674_v13  ;;  %v678_v20 = vcombine.high %v62_v14, %v66_v15  ;;  %v682_v21 = vcombine.high %v64_v16, %v68_v17  ;;  %v880_v22 = vld [vmem:[#allocation2] sm:$0xff]  ;;  %v884_v24 = vld [vmem:[#allocation2 + $0x10] sm:$0xff]  ;;  %v677_v30 = vcombine.low %v62_v14, %v66_v15  ;;  %v55_v10 = vld [vmem:[#allocation5 + $0x48] sm:$0xff] }
  0x2d   :  { %v654_v23 = vcombine.high %v880_v22, %v880_v22  ;;  %v658_v25 = vcombine.high %v884_v24, %v884_v24  ;;  %v70_v26 = vld [vmem:[#allocation5 + $0xc0] sm:$0xff]  ;;  %v72_v28 = vld [vmem:[#allocation5 + $0xd0] sm:$0xff]  ;;  %v681_v31 = vcombine.low %v64_v16, %v68_v17  ;;  %v668_v9 = vcombine.high %v49_v4, %v53_v5  ;;  %v59_v11 = vld [vmem:[#allocation5 + $0x68] sm:$0xff] }
  0x2e   :  { %v74_v27 = vld [vmem:[#allocation5 + $0xe0] sm:$0xff]  ;;  %v76_v29 = vld [vmem:[#allocation5 + $0xf0] sm:$0xff]  ;;  %v653_v12 = vcombine.low %v880_v22, %v880_v22  ;;  %v57_v13 = vld [vmem:[#allocation5 + $0x58] sm:$0xff]  ;;  %v663_v16 = vcombine.low %v47_v2, %v51_v3  ;;  %v657_v17 = vcombine.low %v884_v24, %v884_v24 }
  0x2f   :  { %497 = vmatprep.mubr.bf16.mxu1 %v654_v23  ;;  %577 = vmatprep.mubr.bf16.mxu0 %v658_v25  ;;  %v686_v32 = vcombine.high %v70_v26, %v74_v27  ;;  %v690_v33 = vcombine.high %v72_v28, %v76_v29  ;;  %v78_v34 = vld [vmem:[#allocation5 + $0x100] sm:$0xff]  ;;  %v80_v36 = vld [vmem:[#allocation5 + $0x110] sm:$0xff]  ;;  %v685_v38 = vcombine.low %v70_v26, %v74_v27  ;;  %v61_v14 = vld [vmem:[#allocation5 + $0x78] sm:$0xff] }
  0x30   :  { %v82_v35 = vld [vmem:[#allocation5 + $0x120] sm:$0xff]  ;;  %v84_v37 = vld [vmem:[#allocation5 + $0x130] sm:$0xff]  ;;  %v689_v39 = vcombine.low %v72_v28, %v76_v29  ;;  %v890_v15 = vld [vmem:[#allocation2 + $0x8] sm:$0xff]  ;;  %v671_v28 = vcombine.low %v55_v10, %v59_v11  ;;  %v675_v29 = vcombine.low %v57_v13, %v61_v14 }
  0x31   :  { %v694_v40 = vcombine.high %v78_v34, %v82_v35  ;;  %v698_v41 = vcombine.high %v80_v36, %v84_v37  ;;  %v86_v42 = vld [vmem:[#allocation5 + $0x140] sm:$0xff]  ;;  %v88_v44 = vld [vmem:[#allocation5 + $0x150] sm:$0xff]  ;;  %v693_v46 = vcombine.low %v78_v34, %v82_v35  ;;  %v697_v47 = vcombine.low %v80_v36, %v84_v37  ;;  %v63_v25 = vld [vmem:[#allocation5 + $0x88] sm:$0xff] }
  0x32   :  { %v90_v43 = vld [vmem:[#allocation5 + $0x160] sm:$0xff]  ;;  %v92_v45 = vld [vmem:[#allocation5 + $0x170] sm:$0xff]  ;;  %v656_v23 = vcombine.high %v890_v15, %v890_v15  ;;  %v67_v26 = vld [vmem:[#allocation5 + $0xa8] sm:$0xff] }
  0x33   :  { %468 = vmatpush1.bf16.xpose.msra.mxu1 %v669_v18  ;;  %548 = vmatpush1.bf16.xpose.msra.mxu0 %v673_v19  ;;  %v702_v48 = vcombine.high %v86_v42, %v90_v43  ;;  %v706_v49 = vcombine.high %v88_v44, %v92_v45  ;;  %v94_v50 = vld [vmem:[#allocation5 + $0x180] sm:$0xff]  ;;  %v96_v52 = vld [vmem:[#allocation5 + $0x190] sm:$0xff]  ;;  %v701_v54 = vcombine.low %v86_v42, %v90_v43  ;;  %v894_v18 = vld [vmem:[#allocation2 + $0x18] sm:$0xff] }
  0x34   :  { %469 = vmatprep.subr.bf16.mxu1 %v678_v20  ;;  %549 = vmatprep.subr.bf16.mxu0 %v682_v21  ;;  %v98_v51 = vld [vmem:[#allocation5 + $0x1a0] sm:$0xff]  ;;  %v100_v53 = vld [vmem:[#allocation5 + $0x1b0] sm:$0xff]  ;;  %v705_v55 = vcombine.low %v88_v44, %v92_v45  ;;  %v667_v19 = vcombine.low %v49_v4, %v53_v5  ;;  %v672_v20 = vcombine.high %v55_v10, %v59_v11  ;;  %v65_v24 = vld [vmem:[#allocation5 + $0x98] sm:$0xff] }
  0x35   :  { %v710_v56 = vcombine.high %v94_v50, %v98_v51  ;;  %v714_v57 = vcombine.high %v96_v52, %v100_v53  ;;  %v102_v58 = vld [vmem:[#allocation5 + $0x1c0] sm:$0xff]  ;;  %v104_v60 = vld [vmem:[#allocation5 + $0x1d0] sm:$0xff]  ;;  %v709_v62 = vcombine.low %v94_v50, %v98_v51  ;;  %v713_v63 = vcombine.low %v96_v52, %v100_v53  ;;  %v69_v27 = vld [vmem:[#allocation5 + $0xb8] sm:$0xff] }
  0x36   :  { %v106_v59 = vld [vmem:[#allocation5 + $0x1e0] sm:$0xff]  ;;  %v108_v61 = vld [vmem:[#allocation5 + $0x1f0] sm:$0xff]  ;;  %v676_v21 = vcombine.high %v57_v13, %v61_v14  ;;  %v660_v22 = vcombine.high %v894_v18, %v894_v18  ;;  %v73_v34 = vld [vmem:[#allocation5 + $0xd8] sm:$0xff]  ;;  %v679_v36 = vcombine.low %v63_v25, %v67_v26  ;;  %v683_v37 = vcombine.low %v65_v24, %v69_v27 }
  0x37   :  { %v718_v0 = vcombine.high %v102_v58, %v106_v59  ;;  %v722_v1 = vcombine.high %v104_v60, %v108_v61  ;;  %v717_v6 = vcombine.low %v102_v58, %v106_v59  ;;  %v721_v7 = vcombine.low %v104_v60, %v108_v61  ;;  %v77_v35 = vld [vmem:[#allocation5 + $0xf8] sm:$0xff] }
  0x38   :  { %v81_v42 = vld [vmem:[#allocation5 + $0x118] sm:$0xff]  ;;  %v691_v45 = vcombine.low %v73_v34, %v77_v35  ;;  %v655_v10 = vcombine.low %v890_v15, %v890_v15  ;;  %v659_v11 = vcombine.low %v894_v18, %v894_v18 }
  0x39   :  { %v85_v43 = vld [vmem:[#allocation5 + $0x138] sm:$0xff] }
  0x3a   :  { %v89_v50 = vld [vmem:[#allocation5 + $0x158] sm:$0xff]  ;;  %v699_v53 = vcombine.low %v81_v42, %v85_v43 }
  0x3b   :  { %470 = vmatpush1.bf16.xpose.msra.mxu1 %v677_v30  ;;  %550 = vmatpush1.bf16.xpose.msra.mxu0 %v681_v31  ;;  %v680_v30 = vcombine.high %v63_v25, %v67_v26  ;;  %v684_v31 = vcombine.high %v65_v24, %v69_v27  ;;  %v93_v51 = vld [vmem:[#allocation5 + $0x178] sm:$0xff] }
  0x3c   :  { %471 = vmatprep.subr.bf16.mxu1 %v686_v32  ;;  %551 = vmatprep.subr.bf16.mxu0 %v690_v33  ;;  %v71_v32 = vld [vmem:[#allocation5 + $0xc8] sm:$0xff]  ;;  %v97_v58 = vld [vmem:[#allocation5 + $0x198] sm:$0xff]  ;;  %v707_v61 = vcombine.low %v89_v50, %v93_v51 }
  0x3d   :  { %v75_v33 = vld [vmem:[#allocation5 + $0xe8] sm:$0xff]  ;;  %v101_v59 = vld [vmem:[#allocation5 + $0x1b8] sm:$0xff] }
  0x3e   :  { %v687_v44 = vcombine.low %v71_v32, %v75_v33  ;;  %v105_v2 = vld [vmem:[#allocation5 + $0x1d8] sm:$0xff]  ;;  %v715_v5 = vcombine.low %v97_v58, %v101_v59 }
  0x3f   :  { %v109_v3 = vld [vmem:[#allocation5 + $0x1f8] sm:$0xff] }
  0x43   :  { %472 = vmatpush1.bf16.xpose.msra.mxu1 %v685_v38  ;;  %552 = vmatpush1.bf16.xpose.msra.mxu0 %v689_v39  ;;  %v688_v38 = vcombine.high %v71_v32, %v75_v33  ;;  %v692_v39 = vcombine.high %v73_v34, %v77_v35 }
  0x44   :  { %473 = vmatprep.subr.bf16.mxu1 %v694_v40  ;;  %553 = vmatprep.subr.bf16.mxu0 %v698_v41  ;;  %v79_v40 = vld [vmem:[#allocation5 + $0x108] sm:$0xff] }
  0x45   :  { %v83_v41 = vld [vmem:[#allocation5 + $0x128] sm:$0xff] }
  0x46   :  { %v695_v52 = vcombine.low %v79_v40, %v83_v41 }
  0x4b   :  { %474 = vmatpush1.bf16.xpose.msra.mxu1 %v693_v46  ;;  %554 = vmatpush1.bf16.xpose.msra.mxu0 %v697_v47  ;;  %v696_v46 = vcombine.high %v79_v40, %v83_v41  ;;  %v700_v47 = vcombine.high %v81_v42, %v85_v43 }
  0x4c   :  { %475 = vmatprep.subr.bf16.mxu1 %v702_v48  ;;  %555 = vmatprep.subr.bf16.mxu0 %v706_v49  ;;  %v87_v48 = vld [vmem:[#allocation5 + $0x148] sm:$0xff] }
  0x4d   :  { %v91_v49 = vld [vmem:[#allocation5 + $0x168] sm:$0xff] }
  0x4e   :  { %v703_v60 = vcombine.low %v87_v48, %v91_v49 }
  0x53   :  { %476 = vmatpush1.bf16.xpose.msra.mxu1 %v701_v54  ;;  %556 = vmatpush1.bf16.xpose.msra.mxu0 %v705_v55  ;;  %v704_v54 = vcombine.high %v87_v48, %v91_v49  ;;  %v708_v55 = vcombine.high %v89_v50, %v93_v51 }
  0x54   :  { %477 = vmatprep.subr.bf16.mxu1 %v710_v56  ;;  %557 = vmatprep.subr.bf16.mxu0 %v714_v57  ;;  %v95_v56 = vld [vmem:[#allocation5 + $0x188] sm:$0xff] }
  0x55   :  { %v99_v57 = vld [vmem:[#allocation5 + $0x1a8] sm:$0xff] }
  0x56   :  { %v711_v4 = vcombine.low %v95_v56, %v99_v57 }
  0x5b   :  { %478 = vmatpush1.bf16.xpose.msra.mxu1 %v709_v62  ;;  %558 = vmatpush1.bf16.xpose.msra.mxu0 %v713_v63  ;;  %v712_v62 = vcombine.high %v95_v56, %v99_v57  ;;  %v716_v63 = vcombine.high %v97_v58, %v101_v59 }
  0x5c   :  { %479 = vmatprep.subr.bf16.mxu1 %v718_v0  ;;  %559 = vmatprep.subr.bf16.mxu0 %v722_v1  ;;  %v103_v0 = vld [vmem:[#allocation5 + $0x1c8] sm:$0xff] }
  0x5d   :  { %v107_v1 = vld [vmem:[#allocation5 + $0x1e8] sm:$0xff] }
  0x63   :  { %480 = vmatpush1.bf16.xpose.msra.mxu1 %v717_v6  ;;  %560 = vmatpush1.bf16.xpose.msra.mxu0 %v721_v7  ;;  %v720_v6 = vcombine.high %v103_v0, %v107_v1  ;;  %v724_v7 = vcombine.high %v105_v2, %v109_v3 }
  0x64   :  { %505 = vmatprep.subr.bf16.mxu1 %v664_v8  ;;  %585 = vmatprep.subr.bf16.mxu0 %v668_v9  ;;  %v719_v8 = vcombine.low %v103_v0, %v107_v1  ;;  %v723_v9 = vcombine.low %v105_v2, %v109_v3 }
  0x6a   :  { %498 = vmatmul.mubr.bf16.vlgmr.msra.gmra.mrb[0].mxu1 %v653_v12  ;;  %578 = vmatmul.mubr.bf16.vlgmr.msra.gmra.mrb[0].mxu0 %v657_v17  ;;  %v652_v12 = vld [vmem:[%s921_s2] ss:$0 sm:$0xff]  ;;  %s828_s2 = smov [#allocation7]  }
  0x6b   :  { %506 = vmatpush1.bf16.xpose.msra.mxu1 %v663_v16  ;;  %586 = vmatpush1.bf16.xpose.msra.mxu0 %v667_v19  ;;  %s642_s11 = sshll.u32 %s828_s2, 4  ;;  %s643_s11 = int_to_ptr.vmem [resolvable:$true] %s642_s11 }
  0x6c   :  { %507 = vmatprep.subr.bf16.mxu1 %v672_v20  ;;  %587 = vmatprep.subr.bf16.mxu0 %v676_v21  ;;  %s796_s12 = scalar_lea.vmem %s643_s11, 128  ;;  %p801_p3 = scmp.lt.s32.totalorder %s643_s11, %s643_s11 }
  0x6d   :  { %537 = vmatprep.mubr.bf16.mxu1 %v656_v23  ;;  %617 = vmatprep.mubr.bf16.mxu0 %v660_v22  ;;  %p797_p2 = scmp.ne.s32.totalorder %s643_s11, %s796_s12  ;;  %p802_p4 = scmp.lt.s32.totalorder %s796_s12, %s796_s12 }
  0x6f   :  { %p803_p5 = por %p802_p4, %p801_p3 }
  0x71   :  { %p804_p6 = pnand %p803_p5, %p797_p2 }
  0x73   :  { %508 = vmatpush1.bf16.xpose.msra.mxu1 %v671_v28  ;;  %588 = vmatpush1.bf16.xpose.msra.mxu0 %v675_v29 }
  0x74   :  { %509 = vmatprep.subr.bf16.mxu1 %v680_v30  ;;  %589 = vmatprep.subr.bf16.mxu0 %v684_v31 }
  0x7b   :  { %510 = vmatpush1.bf16.xpose.msra.mxu1 %v679_v36  ;;  %590 = vmatpush1.bf16.xpose.msra.mxu0 %v683_v37 }
  0x7c   :  { %511 = vmatprep.subr.bf16.mxu1 %v688_v38  ;;  %591 = vmatprep.subr.bf16.mxu0 %v692_v39 }
  0x83   :  { %512 = vmatpush1.bf16.xpose.msra.mxu1 %v687_v44  ;;  %592 = vmatpush1.bf16.xpose.msra.mxu0 %v691_v45 }
  0x84   :  { %513 = vmatprep.subr.bf16.mxu1 %v696_v46  ;;  %593 = vmatprep.subr.bf16.mxu0 %v700_v47 }
  0x8b   :  { %514 = vmatpush1.bf16.xpose.msra.mxu1 %v695_v52  ;;  %594 = vmatpush1.bf16.xpose.msra.mxu0 %v699_v53 }
  0x8c   :  { %515 = vmatprep.subr.bf16.mxu1 %v704_v54  ;;  %595 = vmatprep.subr.bf16.mxu0 %v708_v55 }
  0x93   :  { %516 = vmatpush1.bf16.xpose.msra.mxu1 %v703_v60  ;;  %596 = vmatpush1.bf16.xpose.msra.mxu0 %v707_v61 }
  0x94   :  { %517 = vmatprep.subr.bf16.mxu1 %v712_v62  ;;  %597 = vmatprep.subr.bf16.mxu0 %v716_v63 }
  0x9b   :  { %518 = vmatpush1.bf16.xpose.msra.mxu1 %v711_v4  ;;  %598 = vmatpush1.bf16.xpose.msra.mxu0 %v715_v5 }
  0x9c   :  { %519 = vmatprep.subr.bf16.mxu1 %v720_v6  ;;  %599 = vmatprep.subr.bf16.mxu0 %v724_v7 }
  0xa3   :  { %520 = vmatpush1.bf16.xpose.msra.mxu1 %v719_v8  ;;  %600 = vmatpush1.bf16.xpose.msra.mxu0 %v723_v9 }
  0xaa   :  { %538 = vmatmul.mubr.bf16.vlgmr.msra.gmra.mrb[0].mxu1 %v655_v10  ;;  %618 = vmatmul.mubr.bf16.vlgmr.msra.gmra.mrb[0].mxu0 %v659_v11 }
 0x17d   :  { %v539_v13 = vpop.f32.mrb[0].mxu1  ;;  %v619_v16 = vpop.f32.mrb[0].mxu0 }
 0x17e   :  { %v725_v14 = vadd.f32 %v652_v12, %v539_v13  ;;  %v541_v17 = vpop.f32.mrb[1].mxu1  ;;  %v621_v19 = vpop.f32.mrb[1].mxu0 }
 0x17f   :  { %v542_v20 = vpop.f32.mrb[2].mxu1  ;;  %v622_v23 = vpop.f32.mrb[2].mxu0 }
 0x180   :  { %v726_v21 = vadd.f32 %v725_v14, %v619_v16  ;;  %v543_v22 = vpop.f32.mrb[3].mxu1  ;;  %v623_v25 = vpop.f32.mrb[3].mxu0 }
 0x182   :  { %625 = vmax.xlane.f32.xlu0 %v726_v21 }
 0x20f   :  { %v626_v15 = vpop.xlane.xlu0 %625 }
 0x210   :  { %v627_v26 = vsub.f32 %v726_v21, %v626_v15 }
 0x212   :  { %v628_v18 = vmul.f32 1.442695, %v627_v26 }
 0x214   :  { %748 = vpow2.f32 %v628_v18 }
 0x21e   :  { %v749_v24 = vpop.eup %748 }
 0x21f   :  { %630 = vadd.xlane.f32.xlu0 %v749_v24 }
 0x2ac   :  { %v631_v27 = vpop.xlane.xlu0 %630 }
 0x2ad   :  { %750 = vlog2.f32 %v631_v27 }
 0x2b7   :  { %v751_v28 = vpop.eup %750 }
 0x2b8   :  { %v633_v29 = vmul.f32 0.6931472, %v751_v28 }
 0x2ba   :  { %v634_v30 = vsub.f32 %v627_v26, %v633_v29 }
 0x2bc   :  { %635 = vst [vmem:[#allocation7] sm:$0xff] %v634_v30 }
 0x2bd   :  { %807 = shalt.err (!%p804_p6)
}
 0x2be   :  { %s808_s15 = scalar_lea.hbm %s922_s3, 128 }
 0x2bf   :  { %p809_p7 = scmp.ne.s32.totalorder %s922_s3, %s808_s15  ;;  %p812_p8 = scmp.lt.u32.totalorder %s808_s15, %s922_s3 }
 0x2c1   :  { %p814_p9 = pnand %p812_p8, %p809_p7 }
 0x2c3   :  { %817 = shalt.err (!%p814_p9)
}
 0x2c4   :  { %645 = dma.vmem_to_hbm [thread:$0]  %s643_s11, 128, %s922_s3, [#allocation4]  }
 0x2c5   :  { %822 = dma.done.wait [#allocation4], 128  }
 0x2c6   :  { %823 = vsyncadd [#allocation4], 4294967168 }
 0x2c7   :  { %649 = vsyncpa [#allocation3], 1 }
 0x2c8   :  { %650 = vsyncpa [#allocation6], 1 }
 0x2c9   :  { %651 = vsyncpa [#allocation4], 1 }

</bundles_post_ra>
